<compile_context>
chip_gen: v7x
topology: tpu7x:2x2x1
jax: 0.10.0
libtpu: 0.0.40
codegen_flags: <defaults>
</compile_context>

<pallas_src>
import jax
import jax.numpy as jnp
from jax import lax
from jax.experimental import pallas as pl
from jax.experimental.pallas import tpu as pltpu


def _round_up(x, m):
    return (x + m - 1) // m * m


def _make_lstm_loss_kernel(T, PB, B, H, L):
    G = 4 * H

    def kernel(x_ref,       # (T*PB, F) f32 — time-major, batch padded to PB rows
               wih_ref,     # (F, 4H)   f32  (= W_ih^T, gate order [i,f,o,g])
               whh_ref,     # (H, 4H)   f32  (= W_hh^T, gate order [i,f,o,g])
               b_ref,       # (1, 4H)   f32  (= b_ih + b_hh, gate order [i,f,o,g])
               wcls_ref,    # (H, L)    f32  (= W_cls^T)
               bcls_ref,    # (1, L)    f32
               labels_ref,  # (PB, 1)   int32 (padded rows = -1)
               out_ref):    # (1, 1)    f32 scalar NLL loss in SMEM
        # ---- prologue: input projection + bias for ALL timesteps as ONE MXU
        #      matmul, kept register-resident (T*PB x 4H f32 = 8 vregs here).
        gx = (jnp.dot(x_ref[...], wih_ref[...],
                      preferred_element_type=jnp.float32)
              + b_ref[...])                                         # (T*PB, 4H)

        whh = whh_ref[...]                                          # hoisted

        # Fused single-tanh gate nonlinearity constants (hoisted, full shape so
        # no per-iteration broadcast_in_dim is emitted):
        #   columns [0, 3H): sigmoid(x) = 0.5*tanh(0.5*x) + 0.5
        #   columns [3H,4H): tanh(x)
        lane = lax.broadcasted_iota(jnp.int32, (PB, G), 1)
        is_sig = lane < 3 * H
        scale = jnp.where(is_sig, jnp.float32(0.5), jnp.float32(1.0))
        alpha = scale
        beta = jnp.where(is_sig, jnp.float32(0.5), jnp.float32(0.0))

        h = jnp.zeros((PB, H), jnp.float32)
        c = jnp.zeros((PB, H), jnp.float32)

        # ---- serial recurrence, fully static unroll; each step reads one
        #      aligned (PB, 4H) slab of the register-resident gx.
        for t in range(T):
            g_lin = gx[t * PB:(t + 1) * PB, :] + jnp.dot(
                h, whh, preferred_element_type=jnp.float32)         # (PB, 4H)
            act = jnp.tanh(g_lin * scale) * alpha + beta            # 1 EUP launch
            i_g = act[:, 0 * H:1 * H]
            f_g = act[:, 1 * H:2 * H]
            o_g = act[:, 2 * H:3 * H]
            g_g = act[:, 3 * H:4 * H]
            c = f_g * c + i_g * g_g
            h = o_g * jnp.tanh(c)                                   # 2nd EUP launch

        # ---- classifier on last hidden state
        logits = (jnp.dot(h, wcls_ref[...],
                          preferred_element_type=jnp.float32)
                  + bcls_ref[...])                                   # (PB, L)

        # stable log_softmax over last dim
        m = jnp.max(logits, axis=-1, keepdims=True)
        lse = jnp.log(jnp.sum(jnp.exp(logits - m), axis=-1, keepdims=True)) + m
        log_probs = logits - lse

        # NLLLoss (mean over the B real rows).  Padded rows carry label -1 so
        # their one-hot (and loss contribution) is exactly zero.
        col = lax.broadcasted_iota(jnp.int32, (PB, L), 1)
        onehot = (col == labels_ref[...]).astype(jnp.float32)        # (PB, L)
        loss = -jnp.sum(log_probs * onehot) * (1.0 / B)
        out_ref[0, 0] = loss                                         # scalar SMEM store

    return kernel


def pack_params(params):
    """One-time parameter prep (NOT in the per-call path): repack the 4H gate
    columns from PyTorch order [i, f, g, o] to kernel order [i, f, o, g]."""
    H = params["w_hh_t"].shape[0]

    def repack(w):
        return jnp.concatenate(
            [w[..., :2 * H], w[..., 3 * H:4 * H], w[..., 2 * H:3 * H]], axis=-1)

    return {
        "wih": repack(params["w_ih_t"]).astype(jnp.float32),
        "whh": repack(params["w_hh_t"]).astype(jnp.float32),
        "b": repack(params["b"]).astype(jnp.float32),
        "wcls": params["w_cls_t"].astype(jnp.float32),
        "bcls": params["b_cls"].astype(jnp.float32),
    }


@jax.jit
def lstm_nll_loss(x_btf, labels, packed):
    """x_btf: (B, T, F) float32 (batch_first, like PyTorch). labels: (B,) int.
    `packed` must come from pack_params() (done once, outside the hot path)."""
    B, T, F = x_btf.shape
    H = packed["whh"].shape[0]
    L = packed["wcls"].shape[1]
    PB = _round_up(B, 8)          # pad batch to the 8-sublane boundary

    # layout glue: batch-first -> time-major, pad batch rows, flatten to (T*PB, F)
    x_tm = jnp.transpose(x_btf.astype(jnp.float32), (1, 0, 2))       # (T, B, F)
    x_pad = jnp.pad(x_tm, ((0, 0), (0, PB - B), (0, 0)))             # (T, PB, F)
    x2d = x_pad.reshape(T * PB, F)

    labels_col = jnp.full((PB, 1), -1, jnp.int32).at[:B, 0].set(
        labels.astype(jnp.int32))

    out = pl.pallas_call(
        _make_lstm_loss_kernel(T, PB, B, H, L),
        out_shape=jax.ShapeDtypeStruct((1, 1), jnp.float32),
        out_specs=pl.BlockSpec(memory_space=pltpu.MemorySpace.SMEM),
    )(x2d, packed["wih"], packed["whh"], packed["b"],
      packed["wcls"], packed["bcls"], labels_col)
    return out[0, 0]


def _reference_loss(x_btf, labels, params):
    """Pure-JAX reference mimicking torch.nn.LSTM + Linear + LogSoftmax + NLLLoss."""
    B, T, F = x_btf.shape
    H = params["w_hh_t"].shape[0]

    def cell(carry, x_t):
        h, c = carry
        gates = x_t @ params["w_ih_t"] + h @ params["w_hh_t"] + params["b"][0]
        i = jax.nn.sigmoid(gates[:, 0 * H:1 * H])
        f = jax.nn.sigmoid(gates[:, 1 * H:2 * H])
        g = jnp.tanh(gates[:, 2 * H:3 * H])
        o = jax.nn.sigmoid(gates[:, 3 * H:4 * H])
        c = f * c + i * g
        h = o * jnp.tanh(c)
        return (h, c), None

    h0 = jnp.zeros((B, H), jnp.float32)
    (h, _), _ = lax.scan(cell, (h0, h0), jnp.transpose(x_btf, (1, 0, 2)))
    logits = h @ params["w_cls_t"] + params["b_cls"][0]
    logp = jax.nn.log_softmax(logits, axis=-1)
    return -jnp.mean(logp[jnp.arange(B), labels])


if __name__ == "__main__":
    # small shapes consistent with the module defaults
    B, T, F, H, L = 2, 8, 6, 32, 2

    key = jax.random.PRNGKey(0)
    ks = jax.random.split(key, 8)
    stdv = 1.0 / jnp.sqrt(H)

    # Deterministic parameter init (uniform, PyTorch-style range); stored
    # pre-transposed in PyTorch gate order [i, f, g, o] along the 4H axis.
    params = {
        "w_ih_t": jax.random.uniform(ks[0], (F, 4 * H), jnp.float32, -stdv, stdv),
        "w_hh_t": jax.random.uniform(ks[1], (H, 4 * H), jnp.float32, -stdv, stdv),
        "b": (jax.random.uniform(ks[2], (1, 4 * H), jnp.float32, -stdv, stdv)
              + jax.random.uniform(ks[3], (1, 4 * H), jnp.float32, -stdv, stdv)),
        "w_cls_t": jax.random.uniform(ks[4], (H, L), jnp.float32, -stdv, stdv),
        "b_cls": jax.random.uniform(ks[5], (1, L), jnp.float32, -stdv, stdv),
    }

    x = jax.random.normal(ks[6], (B, T, F), jnp.float32)
    labels = jax.random.randint(ks[7], (B,), 0, L, jnp.int32)

    # One-time, out of the per-call path.
    packed = jax.tree_util.tree_map(jax.block_until_ready, pack_params(params))

    loss = jax.block_until_ready(lstm_nll_loss(x, labels, packed))
    ref = jax.block_until_ready(_reference_loss(x, labels, params))

    assert jnp.allclose(loss, ref, atol=1e-5, rtol=1e-5), (loss, ref)
    print("KERNEL_OK")
</pallas_src>

<mosaic_0001>
module attributes {stable_mosaic.version = 11 : i64} {
  func.func @kernel(%arg0: memref<64x6xf32, #tpu.memory_space<vmem>>, %arg1: memref<6x128xf32, #tpu.memory_space<vmem>>, %arg2: memref<32x128xf32, #tpu.memory_space<vmem>>, %arg3: memref<1x128xf32, #tpu.memory_space<vmem>>, %arg4: memref<32x2xf32, #tpu.memory_space<vmem>>, %arg5: memref<1x2xf32, #tpu.memory_space<vmem>>, %arg6: memref<8x1xi32, #tpu.memory_space<vmem>>, %arg7: memref<1x1xf32, #tpu.memory_space<smem>>) attributes {dimension_semantics = [], scalar_prefetch = 0 : i64, scratch_operands = 0 : i64, tpu.core_type = #tpu.core_type<tc>} {
    %c0 = arith.constant 0 : index
    %c0_0 = arith.constant 0 : index
    %0 = vector.load %arg0[%c0, %c0_0] : memref<64x6xf32, #tpu.memory_space<vmem>>, vector<64x6xf32>
    %c0_1 = arith.constant 0 : index
    %c0_2 = arith.constant 0 : index
    %1 = vector.load %arg1[%c0_1, %c0_2] : memref<6x128xf32, #tpu.memory_space<vmem>>, vector<6x128xf32>
    %cst = arith.constant dense<0.000000e+00> : vector<64x128xf32>
    %2 = tpu.matmul %0, %1, %cst {dimension_numbers = #tpu.dot_dimension_numbers<[1], [0], [0], [1], [0, 0, 1, 1], [], []>} : vector<64x6xf32>, vector<6x128xf32>, vector<64x128xf32> -> vector<64x128xf32>
    %c0_3 = arith.constant 0 : index
    %c0_4 = arith.constant 0 : index
    %3 = vector.load %arg3[%c0_3, %c0_4] : memref<1x128xf32, #tpu.memory_space<vmem>>, vector<1x128xf32>
    %4 = vector.broadcast %3 : vector<1x128xf32> to vector<64x128xf32>
    %5 = arith.addf %2, %4 : vector<64x128xf32>
    %c0_5 = arith.constant 0 : index
    %c0_6 = arith.constant 0 : index
    %6 = vector.load %arg2[%c0_5, %c0_6] : memref<32x128xf32, #tpu.memory_space<vmem>>, vector<32x128xf32>
    %7 = tpu.iota {dimensions = array<i32: 1>} : vector<8x128xi32>
    %c96_i32 = arith.constant 96 : i32
    %8 = vector.broadcast %c96_i32 : i32 to vector<8x128xi32>
    %9 = arith.cmpi slt, %7, %8 : vector<8x128xi32>
    %cst_7 = arith.constant 5.000000e-01 : f32
    %cst_8 = arith.constant 1.000000e+00 : f32
    %10 = vector.broadcast %cst_7 : f32 to vector<8x128xf32>
    %11 = vector.broadcast %cst_8 : f32 to vector<8x128xf32>
    %12 = arith.select %9, %10, %11 : vector<8x128xi1>, vector<8x128xf32>
    %cst_9 = arith.constant 5.000000e-01 : f32
    %cst_10 = arith.constant 0.000000e+00 : f32
    %13 = vector.broadcast %cst_9 : f32 to vector<8x128xf32>
    %14 = vector.broadcast %cst_10 : f32 to vector<8x128xf32>
    %15 = arith.select %9, %13, %14 : vector<8x128xi1>, vector<8x128xf32>
    %cst_11 = arith.constant 0.000000e+00 : f32
    %16 = vector.broadcast %cst_11 : f32 to vector<8x32xf32>
    %cst_12 = arith.constant 0.000000e+00 : f32
    %17 = vector.broadcast %cst_12 : f32 to vector<8x32xf32>
    %18 = vector.extract_strided_slice %5 {offsets = [0, 0], sizes = [8, 128], strides = [1, 1]} : vector<64x128xf32> to vector<8x128xf32>
    %cst_13 = arith.constant dense<0.000000e+00> : vector<8x128xf32>
    %19 = tpu.matmul %16, %6, %cst_13 {dimension_numbers = #tpu.dot_dimension_numbers<[1], [0], [0], [1], [0, 0, 1, 1], [], []>} : vector<8x32xf32>, vector<32x128xf32>, vector<8x128xf32> -> vector<8x128xf32>
    %20 = arith.addf %18, %19 : vector<8x128xf32>
    %21 = arith.mulf %20, %12 : vector<8x128xf32>
    %22 = math.tanh %21 : vector<8x128xf32>
    %23 = arith.mulf %22, %12 : vector<8x128xf32>
    %24 = arith.addf %23, %15 : vector<8x128xf32>
    %25 = vector.extract_strided_slice %24 {offsets = [0, 0], sizes = [8, 32], strides = [1, 1]} : vector<8x128xf32> to vector<8x32xf32>
    %26 = vector.extract_strided_slice %24 {offsets = [0, 32], sizes = [8, 32], strides = [1, 1]} : vector<8x128xf32> to vector<8x32xf32>
    %27 = vector.extract_strided_slice %24 {offsets = [0, 64], sizes = [8, 32], strides = [1, 1]} : vector<8x128xf32> to vector<8x32xf32>
    %28 = vector.extract_strided_slice %24 {offsets = [0, 96], sizes = [8, 32], strides = [1, 1]} : vector<8x128xf32> to vector<8x32xf32>
    %29 = arith.mulf %26, %17 : vector<8x32xf32>
    %30 = arith.mulf %25, %28 : vector<8x32xf32>
    %31 = arith.addf %29, %30 : vector<8x32xf32>
    %32 = math.tanh %31 : vector<8x32xf32>
    %33 = arith.mulf %27, %32 : vector<8x32xf32>
    %34 = vector.extract_strided_slice %5 {offsets = [8, 0], sizes = [8, 128], strides = [1, 1]} : vector<64x128xf32> to vector<8x128xf32>
    %cst_14 = arith.constant dense<0.000000e+00> : vector<8x128xf32>
    %35 = tpu.matmul %33, %6, %cst_14 {dimension_numbers = #tpu.dot_dimension_numbers<[1], [0], [0], [1], [0, 0, 1, 1], [], []>} : vector<8x32xf32>, vector<32x128xf32>, vector<8x128xf32> -> vector<8x128xf32>
    %36 = arith.addf %34, %35 : vector<8x128xf32>
    %37 = arith.mulf %36, %12 : vector<8x128xf32>
    %38 = math.tanh %37 : vector<8x128xf32>
    %39 = arith.mulf %38, %12 : vector<8x128xf32>
    %40 = arith.addf %39, %15 : vector<8x128xf32>
    %41 = vector.extract_strided_slice %40 {offsets = [0, 0], sizes = [8, 32], strides = [1, 1]} : vector<8x128xf32> to vector<8x32xf32>
    %42 = vector.extract_strided_slice %40 {offsets = [0, 32], sizes = [8, 32], strides = [1, 1]} : vector<8x128xf32> to vector<8x32xf32>
    %43 = vector.extract_strided_slice %40 {offsets = [0, 64], sizes = [8, 32], strides = [1, 1]} : vector<8x128xf32> to vector<8x32xf32>
    %44 = vector.extract_strided_slice %40 {offsets = [0, 96], sizes = [8, 32], strides = [1, 1]} : vector<8x128xf32> to vector<8x32xf32>
    %45 = arith.mulf %42, %31 : vector<8x32xf32>
    %46 = arith.mulf %41, %44 : vector<8x32xf32>
    %47 = arith.addf %45, %46 : vector<8x32xf32>
    %48 = math.tanh %47 : vector<8x32xf32>
    %49 = arith.mulf %43, %48 : vector<8x32xf32>
    %50 = vector.extract_strided_slice %5 {offsets = [16, 0], sizes = [8, 128], strides = [1, 1]} : vector<64x128xf32> to vector<8x128xf32>
    %cst_15 = arith.constant dense<0.000000e+00> : vector<8x128xf32>
    %51 = tpu.matmul %49, %6, %cst_15 {dimension_numbers = #tpu.dot_dimension_numbers<[1], [0], [0], [1], [0, 0, 1, 1], [], []>} : vector<8x32xf32>, vector<32x128xf32>, vector<8x128xf32> -> vector<8x128xf32>
    %52 = arith.addf %50, %51 : vector<8x128xf32>
    %53 = arith.mulf %52, %12 : vector<8x128xf32>
    %54 = math.tanh %53 : vector<8x128xf32>
    %55 = arith.mulf %54, %12 : vector<8x128xf32>
    %56 = arith.addf %55, %15 : vector<8x128xf32>
    %57 = vector.extract_strided_slice %56 {offsets = [0, 0], sizes = [8, 32], strides = [1, 1]} : vector<8x128xf32> to vector<8x32xf32>
    %58 = vector.extract_strided_slice %56 {offsets = [0, 32], sizes = [8, 32], strides = [1, 1]} : vector<8x128xf32> to vector<8x32xf32>
    %59 = vector.extract_strided_slice %56 {offsets = [0, 64], sizes = [8, 32], strides = [1, 1]} : vector<8x128xf32> to vector<8x32xf32>
    %60 = vector.extract_strided_slice %56 {offsets = [0, 96], sizes = [8, 32], strides = [1, 1]} : vector<8x128xf32> to vector<8x32xf32>
    %61 = arith.mulf %58, %47 : vector<8x32xf32>
    %62 = arith.mulf %57, %60 : vector<8x32xf32>
    %63 = arith.addf %61, %62 : vector<8x32xf32>
    %64 = math.tanh %63 : vector<8x32xf32>
    %65 = arith.mulf %59, %64 : vector<8x32xf32>
    %66 = vector.extract_strided_slice %5 {offsets = [24, 0], sizes = [8, 128], strides = [1, 1]} : vector<64x128xf32> to vector<8x128xf32>
    %cst_16 = arith.constant dense<0.000000e+00> : vector<8x128xf32>
    %67 = tpu.matmul %65, %6, %cst_16 {dimension_numbers = #tpu.dot_dimension_numbers<[1], [0], [0], [1], [0, 0, 1, 1], [], []>} : vector<8x32xf32>, vector<32x128xf32>, vector<8x128xf32> -> vector<8x128xf32>
    %68 = arith.addf %66, %67 : vector<8x128xf32>
    %69 = arith.mulf %68, %12 : vector<8x128xf32>
    %70 = math.tanh %69 : vector<8x128xf32>
    %71 = arith.mulf %70, %12 : vector<8x128xf32>
    %72 = arith.addf %71, %15 : vector<8x128xf32>
    %73 = vector.extract_strided_slice %72 {offsets = [0, 0], sizes = [8, 32], strides = [1, 1]} : vector<8x128xf32> to vector<8x32xf32>
    %74 = vector.extract_strided_slice %72 {offsets = [0, 32], sizes = [8, 32], strides = [1, 1]} : vector<8x128xf32> to vector<8x32xf32>
    %75 = vector.extract_strided_slice %72 {offsets = [0, 64], sizes = [8, 32], strides = [1, 1]} : vector<8x128xf32> to vector<8x32xf32>
    %76 = vector.extract_strided_slice %72 {offsets = [0, 96], sizes = [8, 32], strides = [1, 1]} : vector<8x128xf32> to vector<8x32xf32>
    %77 = arith.mulf %74, %63 : vector<8x32xf32>
    %78 = arith.mulf %73, %76 : vector<8x32xf32>
    %79 = arith.addf %77, %78 : vector<8x32xf32>
    %80 = math.tanh %79 : vector<8x32xf32>
    %81 = arith.mulf %75, %80 : vector<8x32xf32>
    %82 = vector.extract_strided_slice %5 {offsets = [32, 0], sizes = [8, 128], strides = [1, 1]} : vector<64x128xf32> to vector<8x128xf32>
    %cst_17 = arith.constant dense<0.000000e+00> : vector<8x128xf32>
    %83 = tpu.matmul %81, %6, %cst_17 {dimension_numbers = #tpu.dot_dimension_numbers<[1], [0], [0], [1], [0, 0, 1, 1], [], []>} : vector<8x32xf32>, vector<32x128xf32>, vector<8x128xf32> -> vector<8x128xf32>
    %84 = arith.addf %82, %83 : vector<8x128xf32>
    %85 = arith.mulf %84, %12 : vector<8x128xf32>
    %86 = math.tanh %85 : vector<8x128xf32>
    %87 = arith.mulf %86, %12 : vector<8x128xf32>
    %88 = arith.addf %87, %15 : vector<8x128xf32>
    %89 = vector.extract_strided_slice %88 {offsets = [0, 0], sizes = [8, 32], strides = [1, 1]} : vector<8x128xf32> to vector<8x32xf32>
    %90 = vector.extract_strided_slice %88 {offsets = [0, 32], sizes = [8, 32], strides = [1, 1]} : vector<8x128xf32> to vector<8x32xf32>
    %91 = vector.extract_strided_slice %88 {offsets = [0, 64], sizes = [8, 32], strides = [1, 1]} : vector<8x128xf32> to vector<8x32xf32>
    %92 = vector.extract_strided_slice %88 {offsets = [0, 96], sizes = [8, 32], strides = [1, 1]} : vector<8x128xf32> to vector<8x32xf32>
    %93 = arith.mulf %90, %79 : vector<8x32xf32>
    %94 = arith.mulf %89, %92 : vector<8x32xf32>
    %95 = arith.addf %93, %94 : vector<8x32xf32>
    %96 = math.tanh %95 : vector<8x32xf32>
    %97 = arith.mulf %91, %96 : vector<8x32xf32>
    %98 = vector.extract_strided_slice %5 {offsets = [40, 0], sizes = [8, 128], strides = [1, 1]} : vector<64x128xf32> to vector<8x128xf32>
    %cst_18 = arith.constant dense<0.000000e+00> : vector<8x128xf32>
    %99 = tpu.matmul %97, %6, %cst_18 {dimension_numbers = #tpu.dot_dimension_numbers<[1], [0], [0], [1], [0, 0, 1, 1], [], []>} : vector<8x32xf32>, vector<32x128xf32>, vector<8x128xf32> -> vector<8x128xf32>
    %100 = arith.addf %98, %99 : vector<8x128xf32>
    %101 = arith.mulf %100, %12 : vector<8x128xf32>
    %102 = math.tanh %101 : vector<8x128xf32>
    %103 = arith.mulf %102, %12 : vector<8x128xf32>
    %104 = arith.addf %103, %15 : vector<8x128xf32>
    %105 = vector.extract_strided_slice %104 {offsets = [0, 0], sizes = [8, 32], strides = [1, 1]} : vector<8x128xf32> to vector<8x32xf32>
    %106 = vector.extract_strided_slice %104 {offsets = [0, 32], sizes = [8, 32], strides = [1, 1]} : vector<8x128xf32> to vector<8x32xf32>
    %107 = vector.extract_strided_slice %104 {offsets = [0, 64], sizes = [8, 32], strides = [1, 1]} : vector<8x128xf32> to vector<8x32xf32>
    %108 = vector.extract_strided_slice %104 {offsets = [0, 96], sizes = [8, 32], strides = [1, 1]} : vector<8x128xf32> to vector<8x32xf32>
    %109 = arith.mulf %106, %95 : vector<8x32xf32>
    %110 = arith.mulf %105, %108 : vector<8x32xf32>
    %111 = arith.addf %109, %110 : vector<8x32xf32>
    %112 = math.tanh %111 : vector<8x32xf32>
    %113 = arith.mulf %107, %112 : vector<8x32xf32>
    %114 = vector.extract_strided_slice %5 {offsets = [48, 0], sizes = [8, 128], strides = [1, 1]} : vector<64x128xf32> to vector<8x128xf32>
    %cst_19 = arith.constant dense<0.000000e+00> : vector<8x128xf32>
    %115 = tpu.matmul %113, %6, %cst_19 {dimension_numbers = #tpu.dot_dimension_numbers<[1], [0], [0], [1], [0, 0, 1, 1], [], []>} : vector<8x32xf32>, vector<32x128xf32>, vector<8x128xf32> -> vector<8x128xf32>
    %116 = arith.addf %114, %115 : vector<8x128xf32>
    %117 = arith.mulf %116, %12 : vector<8x128xf32>
    %118 = math.tanh %117 : vector<8x128xf32>
    %119 = arith.mulf %118, %12 : vector<8x128xf32>
    %120 = arith.addf %119, %15 : vector<8x128xf32>
    %121 = vector.extract_strided_slice %120 {offsets = [0, 0], sizes = [8, 32], strides = [1, 1]} : vector<8x128xf32> to vector<8x32xf32>
    %122 = vector.extract_strided_slice %120 {offsets = [0, 32], sizes = [8, 32], strides = [1, 1]} : vector<8x128xf32> to vector<8x32xf32>
    %123 = vector.extract_strided_slice %120 {offsets = [0, 64], sizes = [8, 32], strides = [1, 1]} : vector<8x128xf32> to vector<8x32xf32>
    %124 = vector.extract_strided_slice %120 {offsets = [0, 96], sizes = [8, 32], strides = [1, 1]} : vector<8x128xf32> to vector<8x32xf32>
    %125 = arith.mulf %122, %111 : vector<8x32xf32>
    %126 = arith.mulf %121, %124 : vector<8x32xf32>
    %127 = arith.addf %125, %126 : vector<8x32xf32>
    %128 = math.tanh %127 : vector<8x32xf32>
    %129 = arith.mulf %123, %128 : vector<8x32xf32>
    %130 = vector.extract_strided_slice %5 {offsets = [56, 0], sizes = [8, 128], strides = [1, 1]} : vector<64x128xf32> to vector<8x128xf32>
    %cst_20 = arith.constant dense<0.000000e+00> : vector<8x128xf32>
    %131 = tpu.matmul %129, %6, %cst_20 {dimension_numbers = #tpu.dot_dimension_numbers<[1], [0], [0], [1], [0, 0, 1, 1], [], []>} : vector<8x32xf32>, vector<32x128xf32>, vector<8x128xf32> -> vector<8x128xf32>
    %132 = arith.addf %130, %131 : vector<8x128xf32>
    %133 = arith.mulf %132, %12 : vector<8x128xf32>
    %134 = math.tanh %133 : vector<8x128xf32>
    %135 = arith.mulf %134, %12 : vector<8x128xf32>
    %136 = arith.addf %135, %15 : vector<8x128xf32>
    %137 = vector.extract_strided_slice %136 {offsets = [0, 0], sizes = [8, 32], strides = [1, 1]} : vector<8x128xf32> to vector<8x32xf32>
    %138 = vector.extract_strided_slice %136 {offsets = [0, 32], sizes = [8, 32], strides = [1, 1]} : vector<8x128xf32> to vector<8x32xf32>
    %139 = vector.extract_strided_slice %136 {offsets = [0, 64], sizes = [8, 32], strides = [1, 1]} : vector<8x128xf32> to vector<8x32xf32>
    %140 = vector.extract_strided_slice %136 {offsets = [0, 96], sizes = [8, 32], strides = [1, 1]} : vector<8x128xf32> to vector<8x32xf32>
    %141 = arith.mulf %138, %127 : vector<8x32xf32>
    %142 = arith.mulf %137, %140 : vector<8x32xf32>
    %143 = arith.addf %141, %142 : vector<8x32xf32>
    %144 = math.tanh %143 : vector<8x32xf32>
    %145 = arith.mulf %139, %144 : vector<8x32xf32>
    %c0_21 = arith.constant 0 : index
    %c0_22 = arith.constant 0 : index
    %146 = vector.load %arg4[%c0_21, %c0_22] : memref<32x2xf32, #tpu.memory_space<vmem>>, vector<32x2xf32>
    %cst_23 = arith.constant dense<0.000000e+00> : vector<8x2xf32>
    %147 = tpu.matmul %145, %146, %cst_23 {dimension_numbers = #tpu.dot_dimension_numbers<[1], [0], [0], [1], [0, 0, 1, 1], [], []>} : vector<8x32xf32>, vector<32x2xf32>, vector<8x2xf32> -> vector<8x2xf32>
    %c0_24 = arith.constant 0 : index
    %c0_25 = arith.constant 0 : index
    %148 = vector.load %arg5[%c0_24, %c0_25] : memref<1x2xf32, #tpu.memory_space<vmem>>, vector<1x2xf32>
    %149 = vector.broadcast %148 : vector<1x2xf32> to vector<8x2xf32>
    %150 = arith.addf %147, %149 : vector<8x2xf32>
    %cst_26 = arith.constant dense<0xFF800000> : vector<8xf32>
    %151 = vector.multi_reduction <maximumf>, %150, %cst_26 [1] : vector<8x2xf32> to vector<8xf32>
    %152 = vector.shape_cast %151 : vector<8xf32> to vector<8x1xf32>
    %153 = vector.broadcast %152 : vector<8x1xf32> to vector<8x2xf32>
    %154 = arith.subf %150, %153 : vector<8x2xf32>
    %155 = math.exp %154 : vector<8x2xf32>
    %cst_27 = arith.constant dense<0.000000e+00> : vector<8xf32>
    %156 = vector.multi_reduction <add>, %155, %cst_27 [1] : vector<8x2xf32> to vector<8xf32>
    %157 = vector.shape_cast %156 : vector<8xf32> to vector<8x1xf32>
    %158 = math.log %157 : vector<8x1xf32>
    %159 = arith.addf %158, %152 : vector<8x1xf32>
    %160 = vector.broadcast %159 : vector<8x1xf32> to vector<8x2xf32>
    %161 = arith.subf %150, %160 : vector<8x2xf32>
    %162 = tpu.iota {dimensions = array<i32: 1>} : vector<8x2xi32>
    %c0_28 = arith.constant 0 : index
    %c0_29 = arith.constant 0 : index
    %163 = vector.load %arg6[%c0_28, %c0_29] : memref<8x1xi32, #tpu.memory_space<vmem>>, vector<8x1xi32>
    %164 = vector.broadcast %163 : vector<8x1xi32> to vector<8x2xi32>
    %165 = arith.cmpi eq, %162, %164 : vector<8x2xi32>
    %166 = arith.extui %165 : vector<8x2xi1> to vector<8x2xi32>
    %167 = arith.sitofp %166 : vector<8x2xi32> to vector<8x2xf32>
    %168 = arith.mulf %161, %167 : vector<8x2xf32>
    %169 = vector.shape_cast %168 : vector<8x2xf32> to vector<1x8x2xf32>
    %cst_30 = arith.constant dense<0.000000e+00> : vector<1xf32>
    %170 = vector.multi_reduction <add>, %169, %cst_30 [1, 2] : vector<1x8x2xf32> to vector<1xf32>
    %171 = vector.shape_cast %170 : vector<1xf32> to vector<1x1x1xf32>
    %172 = vector.extract %171[0, 0, 0] : f32 from vector<1x1x1xf32>
    %cst_31 = arith.constant 0.000000e+00 : f32
    %173 = arith.subf %cst_31, %172 : f32
    %cst_32 = arith.constant 5.000000e-01 : f32
    %174 = arith.mulf %173, %cst_32 : f32
    %c0_33 = arith.constant 0 : index
    %c0_34 = arith.constant 0 : index
    %175 = memref.load %arg7[%c0_33, %c0_34] : memref<1x1xf32, #tpu.memory_space<smem>>
    memref.store %174, %arg7[%c0_33, %c0_34] : memref<1x1xf32, #tpu.memory_space<smem>>
    return
  }
}

</mosaic_0001>

<bundles_post_ra>
// kernel: lstm_nll_loss.1
= control target key start
LH: loop header
LB: loop body
LE: loop exit
PB: predicated region body
PF: predicated region fallthrough
CT: control target
= control target key end

     0   :  { %vm68_vm0 = vcmask 1045504   ;;  %v1396_v3 = vmov 0.0|0.0   ;;  %vm43_vm1 = vcmask 48128   ;;  %s1680_s0 = inlined_call_operand.vmem [shape: f32[64,6], index: 0, kind: input, shape index: {}]   ;;  %s1681_s1 = inlined_call_operand.vmem [shape: f32[6,128], index: 1, kind: input, shape index: {}]   ;;  %s1682_s2 = inlined_call_operand.vmem [shape: f32[32,128], index: 2, kind: input, shape index: {}]   ;;  %s1683_s3 = inlined_call_operand.vmem [shape: f32[1,128], index: 3, kind: input, shape index: {}]   ;;  %s1684_s4 = inlined_call_operand.vmem [shape: f32[32,2], index: 4, kind: input, shape index: {}]   ;;  %s1685_s5 = inlined_call_operand.vmem [shape: f32[1,2], index: 5, kind: input, shape index: {}]   ;;  %s1686_s6 = inlined_call_operand.vmem [shape: s32[8,1], index: 6, kind: input, shape index: {}]   ;;  %s1687_s7 = inlined_call_operand.hbm [shape: f32[1,1], index: 7, kind: output, shape index: {}]  }
   0x1   :  { %v177_v0 = vld [vmem:[%s1682_s2] sm:$0xff]  ;;  %v178_v1 = vld [vmem:[%s1682_s2 + $0x8] sm:$0xff]  ;;  %1283 = vmatprep.subr.bf16.mxu1 %v1396_v3  ;;  %v179_v7 = vld [vmem:[%s1682_s2 + $0x10] sm:$0xff] }
   0x2   :  { %v35_v2 = vld [vmem:[%s1681_s1] sm:$0x3f]  ;;  %v1454_v4 = vpack.c.bf16 %v178_v1, %v177_v0  ;;  %v28_v6 = vld [vmem:[%s1680_s0 + $0x8] sm:$0xff]  ;;  %v180_v8 = vld [vmem:[%s1682_s2 + $0x18] sm:$0xff] }
   0x3   :  { %1170 = vmatprep.subr.msk.mxu0 %vm68_vm0, %v35_v2  ;;  %v27_v5 = vld [vmem:[%s1680_s0] sm:$0xff] }
   0x4   :  { %1171 = vmatpush3.msk.msra.mxu0 %vm68_vm0, %v35_v2  ;;  %1172 = vmatprep.mubr.msk.f32.mxu0 %vm43_vm1, %v27_v5 }
   0x5   :  { %12 = vsyncpa [#allocation3], 0  ;;  %1285 = vmatpush3.bf16.msra.mxu1 %v1454_v4  ;;  %1173 = vmatmul.mubr.msk.f32.vlgmr.msra.gmra.mrb[0].mxu0 %vm43_vm1, %v28_v6  ;;  %v1471_v9 = vpack.c.bf16 %v180_v8, %v179_v7  ;;  %vm1397_vm2 = vmmov 0   ;;  %v1398_v10 = vmov 0.0   ;;  %v181_v11 = vlaneseq  ;;  %v1495_v14 = vld [vmem:[%s1683_s3] ss:$0 sm:$0xff] }
   0x6   :  { %1286 = vmatprep.subr.bf16.mxu1 %v1396_v3  ;;  %1192 = vmatprep.mubr.msk.f32.mxu1 %vm1397_vm2, %v1398_v10  ;;  %v1399_v17 = vmov 1.0   ;;  %s1400_s3 = smov 32   ;;  %s1401_s15 = smov 64   ;;  %vm186_vm4 = vcmask 261120   ;;  %v29_v49 = vld [vmem:[%s1680_s0 + $0x10] sm:$0xff]  ;;  %v30_v50 = vld [vmem:[%s1680_s0 + $0x18] sm:$0xff] }
   0x7   :  { %1295 = vmatprep.subr.bf16.mxu0 %v1396_v3  ;;  %v1490_v13 = vand.u32 127, %v181_v11  ;;  %v31_v51 = vld [vmem:[%s1680_s0 + $0x20] sm:$0xff]  ;;  %1175 = vmatprep.mubr.msk.f32.mxu0 %vm43_vm1, %v29_v49  ;;  %v32_v52 = vld [vmem:[%s1680_s0 + $0x28] sm:$0xff]  ;;  %v33_v53 = vld [vmem:[%s1680_s0 + $0x30] sm:$0xff]  ;;  %vm1047_vm5 = vcmask 15360  }
   0x8   :  { %1297 = vmatpush3.bf16.msra.mxu0 %v1454_v4  ;;  %v34_v54 = vld [vmem:[%s1680_s0 + $0x38] sm:$0xff] }
   0x9   :  { %1288 = vmatpush3.bf16.msra.mxu1 %v1471_v9  ;;  %1298 = vmatprep.subr.bf16.mxu0 %v1396_v3  ;;  %vm183_vm3 = vcmp.lt.s32.totalorder %v1490_v13, 96 }
   0xa   :  { %1289 = vmatprep.subr.bf16.mxu1 %v1396_v3  ;;  %v1499_v18 = vsel %vm183_vm3, 0.5, %v1399_v17  ;;  %v1503_v24 = vsel %vm183_vm3, 0.5, %v1398_v10  ;;  %1176 = vmatmul.mubr.msk.f32.gmra.mrb[2].mxu0 %vm43_vm1, %v30_v50 }
   0xb   :  { %1178 = vmatprep.mubr.msk.f32.mxu0 %vm43_vm1, %v31_v51 }
   0xc   :  { %1193 = vmatmul.mubr.f32.vlgmr.msra.gmra.mrb[0].mxu1 %v1398_v10  ;;  %1300 = vmatpush3.bf16.msra.mxu0 %v1471_v9 }
   0xd   :  { %1291 = vmatpush3.bf16.msra.mxu1 %v1454_v4  ;;  %1203 = vmatprep.mubr.msk.f32.mxu1 %vm1397_vm2, %v1398_v10 }
   0xe   :  { %1292 = vmatprep.subr.bf16.mxu1 %v1396_v3  ;;  %1307 = vmatprep.subr.bf16.mxu0 %v1396_v3 }
   0xf   :  { %1179 = vmatmul.mubr.msk.f32.gmra.mrb[4].mxu0 %vm43_vm1, %v32_v52 }
  0x10   :  { %1181 = vmatprep.mubr.msk.f32.mxu0 %vm43_vm1, %v33_v53 }
  0x11   :  { %1294 = vmatpush3.bf16.msra.mxu1 %v1471_v9 }
  0x12   :  { %1301 = vmatprep.subr.bf16.mxu1 %v1396_v3 }
  0x13   :  { %1182 = vmatmul.mubr.msk.f32.gmra.mrb[6].mxu0 %vm43_vm1, %v34_v54 }
  0x14   :  { %1214 = vmatprep.mubr.msk.f32.mxu0 %vm1397_vm2, %v1398_v10 }
  0xd8   :  { %v1174_v12 = vpop.f32.mrb[0].mxu0 }
  0xd9   :  { %v138_v15 = vpop.f32.mrb[1].mxu0  ;;  %v144_v36 = vadd.f32 %v1174_v12, %v1495_v14 }
  0xda   :  { %v139_v16 = vadd.f32 %v1495_v14, %v138_v15 }
  0xdd   :  { %v1177_v58 = vpop.f32.mrb[2].mxu0 }
  0xde   :  { %v148_v59 = vpop.f32.mrb[3].mxu0 }
  0xdf   :  { %v256_v19 = vpop.f32.mrb[0].mxu1  ;;  %v149_v1 = vadd.f32 %v1495_v14, %v148_v59 }
  0xe0   :  { %v260_v20 = vadd.f32 %v256_v19, %v139_v16  ;;  %v1194_v21 = vpop.f32.mrb[1].mxu1 }
  0xe2   :  { %v261_v22 = vmul.f32 %v260_v20, %v1499_v18  ;;  %v1552_v60 = vpop.f32.mrb[4].mxu0 }
  0xe3   :  { %v1554_v61 = vpop.f32.mrb[5].mxu0 }
  0xe4   :  { %1348 = vtanh.f32 %v261_v22 }
  0xe6   :  { %v1556_v62 = vpop.f32.mrb[6].mxu0 }
  0xe7   :  { %v1558_v63 = vpop.f32.mrb[7].mxu0 }
  0xee   :  { %v1349_v23 = vpop.eup %1348 }
  0xef   :  { %v263_v25 = vmul.f32 %v1349_v23, %v1499_v18 }
  0xf1   :  { %v264_v26 = vadd.f32 %v263_v25, %v1503_v24 }
  0xf3   :  { %267 = vrot.lane.b32.xlu0 %v264_v26, %s1400_s3  ;;  %v265_v29 = vmul.f32 0.0, %v264_v26 }
 0x165   :  { %v268_v27 = vpop.permute.xlu0 %267 }
 0x166   :  { %v270_v28 = vmul.f32 %v268_v27, %v264_v26 }
 0x168   :  { %272 = vrot.lane.b32.xlu0 %v270_v28, %s1400_s3 }
 0x1da   :  { %v273_v30 = vpop.permute.xlu0 %272 }
 0x1db   :  { %v275_v31 = vadd.f32 %v273_v30, %v265_v29 }
 0x1dd   :  { %1350 = vtanh.f32 %v275_v31 }
 0x1e7   :  { %v1351_v32 = vpop.eup %1350 }
 0x1e8   :  { %278 = vrot.lane.b32.xlu1 %v1351_v32, %s1400_s3 }
 0x25a   :  { %v279_v33 = vpop.permute.xlu1 %278 }
 0x25b   :  { %v281_v34 = vmul.f32 %v279_v33, %v264_v26  ;;  %v154_v26 = vadd.f32 %v1177_v58, %v1495_v14 }
 0x25d   :  { %283 = vrot.lane.b32.xlu1 %v281_v34, %s1401_s15 }
 0x2cf   :  { %v284_v35 = vpop.permute.xlu1 %283 }
 0x2d0   :  { %1204 = vmatmul.mubr.msk.f32.vlgmr.msra.gmra.mrb[2].mxu1 %vm186_vm4, %v284_v35 }
 0x2d1   :  { %1303 = vmatpush3.bf16.msra.mxu1 %v1454_v4  ;;  %1225 = vmatprep.mubr.msk.f32.mxu1 %vm1397_vm2, %v1398_v10 }
 0x2d2   :  { %1304 = vmatprep.subr.bf16.mxu1 %v1396_v3 }
 0x2d5   :  { %1306 = vmatpush3.bf16.msra.mxu1 %v1471_v9 }
 0x2d6   :  { %1313 = vmatprep.subr.bf16.mxu1 %v1396_v3 }
 0x3a3   :  { %v353_v37 = vpop.f32.mrb[2].mxu1 }
 0x3a4   :  { %v357_v38 = vadd.f32 %v353_v37, %v144_v36  ;;  %v1205_v39 = vpop.f32.mrb[3].mxu1 }
 0x3a6   :  { %v358_v40 = vmul.f32 %v357_v38, %v1499_v18 }
 0x3a8   :  { %1352 = vtanh.f32 %v358_v40 }
 0x3b2   :  { %v1353_v41 = vpop.eup %1352 }
 0x3b3   :  { %v360_v42 = vmul.f32 %v1353_v41, %v1499_v18 }
 0x3b5   :  { %v361_v43 = vadd.f32 %v360_v42, %v1503_v24 }
 0x3b7   :  { %364 = vrot.lane.b32.xlu0 %v361_v43, %s1400_s3  ;;  %v362_v46 = vmul.f32 %v361_v43, %v275_v31 }
 0x429   :  { %v365_v44 = vpop.permute.xlu0 %364 }
 0x42a   :  { %v367_v45 = vmul.f32 %v365_v44, %v361_v43 }
 0x42c   :  { %369 = vrot.lane.b32.xlu1 %v367_v45, %s1400_s3 }
 0x49e   :  { %v370_v47 = vpop.permute.xlu1 %369 }
 0x49f   :  { %v372_v48 = vadd.f32 %v370_v47, %v362_v46 }
 0x4a1   :  { %1354 = vtanh.f32 %v372_v48 }
 0x4ab   :  { %v1355_v55 = vpop.eup %1354 }
 0x4ac   :  { %375 = vrot.lane.b32.xlu0 %v1355_v55, %s1400_s3 }
 0x51e   :  { %v376_v56 = vpop.permute.xlu0 %375 }
 0x51f   :  { %v378_v57 = vmul.f32 %v376_v56, %v361_v43  ;;  %v159_v43 = vadd.f32 %v1495_v14, %v1554_v61  ;;  %v164_v61 = vadd.f32 %v1552_v60, %v1495_v14 }
 0x521   :  { %380 = vrot.lane.b32.xlu1 %v378_v57, %s1401_s15 }
 0x593   :  { %v381_v0 = vpop.permute.xlu1 %380 }
 0x594   :  { %1215 = vmatmul.mubr.msk.f32.vlgmr.msra.gmra.mrb[8].mxu0 %vm186_vm4, %v381_v0 }
 0x595   :  { %1309 = vmatpush3.bf16.msra.mxu0 %v1454_v4  ;;  %1236 = vmatprep.mubr.msk.f32.mxu0 %vm1397_vm2, %v1398_v10 }
 0x596   :  { %1310 = vmatprep.subr.bf16.mxu0 %v1396_v3 }
 0x599   :  { %1312 = vmatpush3.bf16.msra.mxu0 %v1471_v9 }
 0x59a   :  { %1319 = vmatprep.subr.bf16.mxu0 %v1396_v3 }
 0x667   :  { %v450_v2 = vpop.f32.mrb[8].mxu0 }
 0x668   :  { %v454_v5 = vadd.f32 %v450_v2, %v149_v1  ;;  %v1216_v6 = vpop.f32.mrb[9].mxu0 }
 0x66a   :  { %v455_v7 = vmul.f32 %v454_v5, %v1499_v18 }
 0x66c   :  { %1356 = vtanh.f32 %v455_v7 }
 0x676   :  { %v1357_v8 = vpop.eup %1356 }
 0x677   :  { %v457_v11 = vmul.f32 %v1357_v8, %v1499_v18 }
 0x679   :  { %v458_v12 = vadd.f32 %v457_v11, %v1503_v24 }
 0x67b   :  { %461 = vrot.lane.b32.xlu0 %v458_v12, %s1400_s3  ;;  %v459_v17 = vmul.f32 %v458_v12, %v372_v48 }
 0x6ed   :  { %v462_v15 = vpop.permute.xlu0 %461 }
 0x6ee   :  { %v464_v16 = vmul.f32 %v462_v15, %v458_v12 }
 0x6f0   :  { %466 = vrot.lane.b32.xlu1 %v464_v16, %s1400_s3 }
 0x762   :  { %v467_v19 = vpop.permute.xlu1 %466 }
 0x763   :  { %v469_v20 = vadd.f32 %v467_v19, %v459_v17 }
 0x765   :  { %1358 = vtanh.f32 %v469_v20 }
 0x76f   :  { %v1359_v21 = vpop.eup %1358 }
 0x770   :  { %472 = vrot.lane.b32.xlu0 %v1359_v21, %s1400_s3 }
 0x7e2   :  { %v473_v22 = vpop.permute.xlu0 %472 }
 0x7e3   :  { %v475_v23 = vmul.f32 %v473_v22, %v458_v12 }
 0x7e5   :  { %477 = vrot.lane.b32.xlu1 %v475_v23, %s1401_s15 }
 0x857   :  { %v478_v25 = vpop.permute.xlu1 %477 }
 0x858   :  { %1226 = vmatmul.mubr.msk.f32.vlgmr.msra.gmra.mrb[4].mxu1 %vm186_vm4, %v478_v25 }
 0x859   :  { %1315 = vmatpush3.bf16.msra.mxu1 %v1454_v4  ;;  %1247 = vmatprep.mubr.msk.f32.mxu1 %vm1397_vm2, %v1398_v10 }
 0x85a   :  { %1316 = vmatprep.subr.bf16.mxu1 %v1396_v3 }
 0x85d   :  { %1318 = vmatpush3.bf16.msra.mxu1 %v1471_v9 }
 0x85e   :  { %1325 = vmatprep.subr.bf16.mxu1 %v1396_v3 }
 0x92b   :  { %v547_v27 = vpop.f32.mrb[4].mxu1 }
 0x92c   :  { %v551_v28 = vadd.f32 %v547_v27, %v154_v26  ;;  %v1227_v29 = vpop.f32.mrb[5].mxu1 }
 0x92e   :  { %v552_v30 = vmul.f32 %v551_v28, %v1499_v18 }
 0x930   :  { %1360 = vtanh.f32 %v552_v30 }
 0x93a   :  { %v1361_v31 = vpop.eup %1360 }
 0x93b   :  { %v554_v32 = vmul.f32 %v1361_v31, %v1499_v18 }
 0x93d   :  { %v555_v33 = vadd.f32 %v554_v32, %v1503_v24 }
 0x93f   :  { %558 = vrot.lane.b32.xlu0 %v555_v33, %s1400_s3  ;;  %v556_v36 = vmul.f32 %v555_v33, %v469_v20  ;;  %v169_v20 = vadd.f32 %v1495_v14, %v1558_v63 }
 0x9b1   :  { %v559_v34 = vpop.permute.xlu0 %558 }
 0x9b2   :  { %v561_v35 = vmul.f32 %v559_v34, %v555_v33 }
 0x9b4   :  { %563 = vrot.lane.b32.xlu1 %v561_v35, %s1400_s3 }
 0xa26   :  { %v564_v37 = vpop.permute.xlu1 %563 }
 0xa27   :  { %v566_v38 = vadd.f32 %v564_v37, %v556_v36  ;;  %v174_v37 = vadd.f32 %v1556_v62, %v1495_v14  ;;  %v961_v62 = vld [vmem:[%s1684_s4] sm:$0xff] }
 0xa29   :  { %1362 = vtanh.f32 %v566_v38 }
 0xa33   :  { %v1363_v39 = vpop.eup %1362 }
 0xa34   :  { %569 = vrot.lane.b32.xlu0 %v1363_v39, %s1400_s3 }
 0xaa6   :  { %v570_v40 = vpop.permute.xlu0 %569 }
 0xaa7   :  { %v572_v41 = vmul.f32 %v570_v40, %v555_v33 }
 0xaa9   :  { %574 = vrot.lane.b32.xlu1 %v572_v41, %s1401_s15 }
 0xb1b   :  { %v575_v42 = vpop.permute.xlu1 %574 }
 0xb1c   :  { %1237 = vmatmul.mubr.msk.f32.vlgmr.msra.gmra.mrb[10].mxu0 %vm186_vm4, %v575_v42 }
 0xb1d   :  { %1321 = vmatpush3.bf16.msra.mxu0 %v1454_v4  ;;  %1258 = vmatprep.mubr.msk.f32.mxu0 %vm1397_vm2, %v1398_v10 }
 0xb1e   :  { %1322 = vmatprep.subr.bf16.mxu0 %v1396_v3 }
 0xb21   :  { %1324 = vmatpush3.bf16.msra.mxu0 %v1471_v9 }
 0xb22   :  { %1331 = vmatprep.subr.bf16.mxu0 %v1396_v3 }
 0xbef   :  { %v644_v44 = vpop.f32.mrb[10].mxu0 }
 0xbf0   :  { %v648_v45 = vadd.f32 %v644_v44, %v159_v43  ;;  %v1238_v46 = vpop.f32.mrb[11].mxu0 }
 0xbf2   :  { %v649_v47 = vmul.f32 %v648_v45, %v1499_v18 }
 0xbf4   :  { %1364 = vtanh.f32 %v649_v47 }
 0xbfe   :  { %v1365_v48 = vpop.eup %1364 }
 0xbff   :  { %v651_v49 = vmul.f32 %v1365_v48, %v1499_v18 }
 0xc01   :  { %v652_v50 = vadd.f32 %v651_v49, %v1503_v24 }
 0xc03   :  { %655 = vrot.lane.b32.xlu0 %v652_v50, %s1400_s3  ;;  %v653_v53 = vmul.f32 %v652_v50, %v566_v38 }
 0xc75   :  { %v656_v51 = vpop.permute.xlu0 %655 }
 0xc76   :  { %v658_v52 = vmul.f32 %v656_v51, %v652_v50 }
 0xc78   :  { %660 = vrot.lane.b32.xlu1 %v658_v52, %s1400_s3 }
 0xcea   :  { %v661_v54 = vpop.permute.xlu1 %660 }
 0xceb   :  { %v663_v55 = vadd.f32 %v661_v54, %v653_v53 }
 0xced   :  { %1366 = vtanh.f32 %v663_v55 }
 0xcf7   :  { %v1367_v56 = vpop.eup %1366 }
 0xcf8   :  { %666 = vrot.lane.b32.xlu0 %v1367_v56, %s1400_s3  ;;  %v1113_v56 = vld [vmem:[%s1685_s5] ss:$0 sm:$0xff] }
 0xd6a   :  { %v667_v57 = vpop.permute.xlu0 %666 }
 0xd6b   :  { %v669_v58 = vmul.f32 %v667_v57, %v652_v50  ;;  %v964_v50 = vld [vmem:[%s1684_s4 + $0x18] sm:$0xff] }
 0xd6d   :  { %671 = vrot.lane.b32.xlu1 %v669_v58, %s1401_s15 }
 0xddf   :  { %v672_v59 = vpop.permute.xlu1 %671 }
 0xde0   :  { %1248 = vmatmul.mubr.msk.f32.vlgmr.msra.gmra.mrb[6].mxu1 %vm186_vm4, %v672_v59 }
 0xde1   :  { %1327 = vmatpush3.bf16.msra.mxu1 %v1454_v4  ;;  %1269 = vmatprep.mubr.msk.f32.mxu1 %vm1397_vm2, %v1398_v10 }
 0xde2   :  { %1328 = vmatprep.subr.bf16.mxu1 %v1396_v3 }
 0xde5   :  { %1330 = vmatpush3.bf16.msra.mxu1 %v1471_v9 }
 0xeb3   :  { %v741_v0 = vpop.f32.mrb[6].mxu1 }
 0xeb4   :  { %v745_v1 = vadd.f32 %v741_v0, %v164_v61  ;;  %v1249_v2 = vpop.f32.mrb[7].mxu1  ;;  %v1061_v61 = vld [vmem:[%s1686_s6] sm:$0xff]  ;;  %v1402_v0 = vmov 0  }
 0xeb5   :  { %1347 = vset.pattern.permute.xlu0 %v1402_v0 }
 0xeb6   :  { %v746_v5 = vmul.f32 %v745_v1, %v1499_v18 }
 0xeb8   :  { %1368 = vtanh.f32 %v746_v5 }
 0xec2   :  { %v1369_v6 = vpop.eup %1368 }
 0xec3   :  { %v748_v7 = vmul.f32 %v1369_v6, %v1499_v18 }
 0xec5   :  { %v749_v4 = vadd.f32 %v748_v7, %v1503_v24 }
 0xec7   :  { %752 = vrot.lane.b32.xlu0 %v749_v4, %s1400_s3  ;;  %v750_v9 = vmul.f32 %v749_v4, %v663_v55 }
 0xf39   :  { %v753_v8 = vpop.permute.xlu0 %752 }
 0xf3a   :  { %v755_v11 = vmul.f32 %v753_v8, %v749_v4 }
 0xf3c   :  { %757 = vrot.lane.b32.xlu1 %v755_v11, %s1400_s3 }
 0xfae   :  { %v758_v12 = vpop.permute.xlu1 %757 }
 0xfaf   :  { %v760_v60 = vadd.f32 %v758_v12, %v750_v9 }
 0xfb1   :  { %1370 = vtanh.f32 %v760_v60 }
 0xfbb   :  { %v1371_v15 = vpop.eup %1370 }
 0xfbc   :  { %763 = vrot.lane.b32.xlu0 %v1371_v15, %s1400_s3 }
0x102e   :  { %v764_v16 = vpop.permute.xlu0 %763 }
0x102f   :  { %v766_v17 = vmul.f32 %v764_v16, %v749_v4 }
0x1031   :  { %768 = vrot.lane.b32.xlu1 %v766_v17, %s1401_s15 }
0x10a3   :  { %v769_v19 = vpop.permute.xlu1 %768 }
0x10a4   :  { %1259 = vmatmul.mubr.msk.f32.vlgmr.msra.gmra.mrb[12].mxu0 %vm186_vm4, %v769_v19 }
0x10a5   :  { %1280 = vmatprep.mubr.msk.f32.mxu0 %vm1397_vm2, %v1398_v10 }
0x1177   :  { %v838_v21 = vpop.f32.mrb[12].mxu0 }
0x1178   :  { %v842_v22 = vadd.f32 %v838_v21, %v169_v20  ;;  %v1260_v23 = vpop.f32.mrb[13].mxu0 }
0x117a   :  { %v843_v25 = vmul.f32 %v842_v22, %v1499_v18 }
0x117c   :  { %1372 = vtanh.f32 %v843_v25 }
0x1186   :  { %v1373_v26 = vpop.eup %1372 }
0x1187   :  { %v845_v27 = vmul.f32 %v1373_v26, %v1499_v18 }
0x1189   :  { %v846_v28 = vadd.f32 %v845_v27, %v1503_v24 }
0x118b   :  { %849 = vrot.lane.b32.xlu0 %v846_v28, %s1400_s3  ;;  %v847_v31 = vmul.f32 %v846_v28, %v760_v60 }
0x11fd   :  { %v850_v29 = vpop.permute.xlu0 %849 }
0x11fe   :  { %v852_v30 = vmul.f32 %v850_v29, %v846_v28 }
0x1200   :  { %854 = vrot.lane.b32.xlu1 %v852_v30, %s1400_s3 }
0x1272   :  { %v855_v32 = vpop.permute.xlu1 %854 }
0x1273   :  { %v857_v63 = vadd.f32 %v855_v32, %v847_v31 }
0x1275   :  { %1374 = vtanh.f32 %v857_v63 }
0x127f   :  { %v1375_v33 = vpop.eup %1374 }
0x1280   :  { %860 = vrot.lane.b32.xlu0 %v1375_v33, %s1400_s3 }
0x12f2   :  { %v861_v34 = vpop.permute.xlu0 %860 }
0x12f3   :  { %v863_v35 = vmul.f32 %v861_v34, %v846_v28 }
0x12f5   :  { %865 = vrot.lane.b32.xlu1 %v863_v35, %s1401_s15 }
0x1367   :  { %v866_v36 = vpop.permute.xlu1 %865 }
0x1368   :  { %1270 = vmatmul.mubr.msk.f32.vlgmr.msra.gmra.mrb[8].mxu1 %vm186_vm4, %v866_v36 }
0x143b   :  { %v935_v38 = vpop.f32.mrb[8].mxu1 }
0x143c   :  { %v939_v39 = vadd.f32 %v935_v38, %v174_v37  ;;  %v1271_v40 = vpop.f32.mrb[9].mxu1 }
0x143e   :  { %v940_v41 = vmul.f32 %v939_v39, %v1499_v18 }
0x1440   :  { %1376 = vtanh.f32 %v940_v41 }
0x144a   :  { %v1377_v42 = vpop.eup %1376 }
0x144b   :  { %v942_v43 = vmul.f32 %v1377_v42, %v1499_v18  ;;  %v962_v18 = vld [vmem:[%s1684_s4 + $0x8] sm:$0xff] }
0x144c   :  { %v1332_v49 = vpack.c.bf16 %v962_v18, %v961_v62 }
0x144d   :  { %v943_v44 = vadd.f32 %v942_v43, %v1503_v24  ;;  %v963_v24 = vld [vmem:[%s1684_s4 + $0x10] sm:$0xff] }
0x144e   :  { %1333 = vmatpush3.bf16.msra.mxu0 %v1332_v49  ;;  %v1335_v51 = vpack.c.bf16 %v964_v50, %v963_v24 }
0x144f   :  { %946 = vrot.lane.b32.xlu0 %v943_v44, %s1400_s3  ;;  %v944_v47 = vmul.f32 %v943_v44, %v857_v63  ;;  %1334 = vmatprep.subr.bf16.mxu0 %v1396_v3 }
0x1452   :  { %1336 = vmatpush3.bf16.msra.mxu0 %v1335_v51 }
0x14c1   :  { %v947_v45 = vpop.permute.xlu0 %946 }
0x14c2   :  { %v949_v46 = vmul.f32 %v947_v45, %v943_v44 }
0x14c4   :  { %951 = vrot.lane.b32.xlu1 %v949_v46, %s1400_s3 }
0x1536   :  { %v952_v48 = vpop.permute.xlu1 %951 }
0x1537   :  { %v954_v14 = vadd.f32 %v952_v48, %v944_v47 }
0x1539   :  { %1378 = vtanh.f32 %v954_v14 }
0x1543   :  { %v1379_v52 = vpop.eup %1378 }
0x1544   :  { %957 = vrot.lane.b32.xlu0 %v1379_v52, %s1400_s3 }
0x15b6   :  { %v958_v53 = vpop.permute.xlu0 %957 }
0x15b7   :  { %v960_v54 = vmul.f32 %v958_v53, %v943_v44 }
0x15b9   :  { %973 = vrot.lane.b32.xlu1 %v960_v54, %s1401_s15  ;;  %s1384_s15 = scalar_lea.hbm %s1687_s7, 16 }
0x15ba   :  { %p1385_p0 = scmp.ne.s32.totalorder %s1687_s7, %s1384_s15  ;;  %p1388_p1 = scmp.lt.u32.totalorder %s1384_s15, %s1687_s7 }
0x15bc   :  { %p1390_p2 = pnand %p1388_p1, %p1385_p0 }
0x162b   :  { %v974_v55 = vpop.permute.xlu1 %973 }
0x162c   :  { %1281 = vmatmul.mubr.msk.f32.vlgmr.msra.gmra.mrb[14].mxu0 %vm186_vm4, %v974_v55 }
0x16ff   :  { %v1043_v57 = vpop.f32.mrb[14].mxu0 }
0x1700   :  { %v1044_v58 = vadd.f32 %v1113_v56, %v1043_v57  ;;  %v1282_v59 = vpop.f32.mrb[15].mxu0 }
0x1702   :  { %v1048_v3 = vsel %vm1047_vm5, %v1044_v58, -inf }
0x1703   :  { %1049 = vmax.xlane.f32.xlu0 %v1048_v3 }
0x1719   :  { %1063 = vperm.xlu0 %1347, %v1061_v61  }
0x1790   :  { %v1050_v1 = vpop.xlane.xlu0 %1049 }
0x1791   :  { %v1051_v2 = vsub.f32 %v1044_v58, %v1050_v1 }
0x1793   :  { %v1052_v5 = vmul.f32 1.442695, %v1051_v2 }
0x1795   :  { %1380 = vpow2.f32 %v1052_v5 }
0x1798   :  { %v1064_v8 = vpop.permute.xlu0 %1063 }
0x1799   :  { %vm1065_vm6 = vcmp.eq.s32.totalorder %v1490_v13, %v1064_v8 }
0x179a   :  { %v1115_v60 = vsel %vm1065_vm6, 1.0, %v1398_v10 }
0x179f   :  { %v1381_v6 = vpop.eup %1380 }
0x17a0   :  { %v1054_v7 = vsel %vm1047_vm5, %v1381_v6, 0.0 }
0x17a1   :  { %1055 = vadd.xlane.f32.xlu1 %v1054_v7 }
0x182e   :  { %v1056_v4 = vpop.xlane.xlu1 %1055 }
0x182f   :  { %1382 = vlog2.f32 %v1056_v4 }
0x1839   :  { %v1383_v11 = vpop.eup %1382 }
0x183a   :  { %v1058_v9 = vmul.f32 0.6931472, %v1383_v11 }
0x183c   :  { %v1059_v12 = vadd.f32 %v1058_v9, %v1050_v1 }
0x183e   :  { %v1060_v15 = vsub.f32 %v1044_v58, %v1059_v12 }
0x1840   :  { %v1068_v16 = vmul.f32 %v1115_v60, %v1060_v15 }
0x1842   :  { %v1069_v17 = vsel %vm1047_vm5, %v1068_v16, 0.0 }
0x1843   :  { %1070 = vadd.xlane.f32.xlu1 %v1069_v17 }
0x18d0   :  { %v1071_v19 = vpop.xlane.xlu1 %1070 }
0x18d1   :  { %v1072_v20 = vrot.slane %v1071_v19, 4 }
0x18d3   :  { %v1073_v21 = vadd.f32 %v1072_v20, %v1071_v19 }
0x18d5   :  { %v1074_v22 = vrot.slane %v1073_v21, 2 }
0x18d7   :  { %v1075_v23 = vadd.f32 %v1074_v22, %v1073_v21 }
0x18d9   :  { %v1076_v25 = vrot.slane %v1075_v23, 1 }
0x18db   :  { %v1077_v26 = vadd.f32 %v1076_v25, %v1075_v23 }
0x18dd   :  { %1337 = vpush %v1077_v26 }
0x190e   :  { %s1338_s5 = spop %1337 }
0x190f   :  { %s1079_s6 = ssub.f32 0.0, %s1338_s5 }
0x1911   :  { %s1080_s2 = smul.f32 0.5, %s1079_s6 }
0x1913   :  { %1082 = sst [smem:[#allocation2]] %s1080_s2 }
0x1914   :  { %1393 = shalt.err (!%p1390_p2)
}
0x1915   :  { %s1403_s20 = smov [#allocation2]  }
0x1916   :  { %1090 = dma.smem_to_hbm %s1403_s20, 16, %s1687_s7, [#allocation3]  }
0x1917   :  { %1394 = dma.done.wait [#allocation3], 16  }
0x1918   :  { %1395 = vsyncadd [#allocation3], 4294967280 }
0x1919   :  { %1094 = sfence }
0x191a   :  { %1095 = vsyncpa [#allocation3], 1 }

</bundles_post_ra>
